<compile_context>
chip_gen: v7x
topology: tpu7x:2x2x1
jax: 0.10.0
libtpu: 0.0.40
codegen_flags: <defaults>
</compile_context>

<pallas_src>
import functools

import jax
import jax.numpy as jnp
from jax.experimental import pallas as pl
from jax.experimental.pallas import tpu as pltpu

_LANES = 128
_SUBLANES = 8
_MAX_TILE_ROWS = 8192          # (8192, 128) f32 block = 4 MiB per input per buffer
_CHUNK_ROWS = 512              # in-kernel compute chunk (bounds VMEM intermediates)
# Epsilon of the masked mean, reduce_masked_mean convention:
#   sum(loss * valid) / (sum(valid) + EPS)
# TODO(synk): confirm exact EPS used by sakuramoti's maksed_mean (1e-6 assumed).
_EPS = 1e-6


def _vmem_capacity_bytes():
    """Physical VMEM of the current chip (defensive: falls back to 64 MiB)."""
    try:
        return int(pltpu.get_tpu_info().vmem_capacity_bytes)
    except Exception:
        return 64 << 20            # v7x per-TC VMEM; smallest supported generation


def _select_tile_rows(rows_total, num_streams, cap=None):
    """Biggest (multiple-of-8) row block that keeps double-buffered streams
    within ~half of physical VMEM, capped at _MAX_TILE_ROWS and the data size."""
    vmem_cap = _vmem_capacity_bytes()
    budget = max(vmem_cap // 2, 4 << 20)
    per_row_bytes = num_streams * 2 * _LANES * 4        # double-buffered, f32 worst case
    vmem_rows = (budget // per_row_bytes // _SUBLANES) * _SUBLANES
    tile = min(_MAX_TILE_ROWS, vmem_rows, (rows_total // _SUBLANES) * _SUBLANES)
    if cap is not None:
        tile = min(tile, max(_SUBLANES, (int(cap) // _SUBLANES) * _SUBLANES))
    return max(_SUBLANES, tile)


def _balanced_ce_kernel(*refs, max_th, min_th, tile_rows, nblocks,
                        blocks_per_core, has_valid, guard_overflow):
    if has_valid:
        inp_ref, tgt_ref, val_ref, out_ref = refs
    else:
        inp_ref, tgt_ref, out_ref = refs
        val_ref = None

    j = pl.program_id(1)

    @pl.when(j == 0)
    def _init():
        out_ref[...] = jnp.zeros_like(out_ref)

    def _accum_chunk(row0, rows):
        sl = pl.ds(row0, rows)
        x = inp_ref[sl, :].astype(jnp.float32)
        t = tgt_ref[sl, :].astype(jnp.float32)

        if has_valid:
            v = val_ref[sl, :].astype(jnp.float32)
            pos_valid = jnp.where(t > max_th, v, 0.0)
            neg_valid = jnp.where(t < min_th, v, 0.0)
        else:
            pos_valid = (t > max_th).astype(jnp.float32)
            neg_valid = (t < min_th).astype(jnp.float32)

        # Shared stable logsigmoid pieces from one relu:
        #   r = max(x, 0), sp = log1p(exp(-|x|))
        #   logsigmoid(x)  = (x - r) - sp
        #   logsigmoid(-x) = -(r + sp)
        r = jnp.maximum(x, 0.0)
        sp = jnp.log1p(jnp.exp(-jnp.abs(x)))

        # Accumulate UN-negated sums (sign restored in the final scalar math
        # outside the kernel) to save per-vreg VALU negations.
        pos_raw = ((x - r) - sp) * t * pos_valid          # = logsigmoid(x)  * t     * mask
        neg_raw = (r + sp) * (1.0 - t) * neg_valid        # = -logsigmoid(-x)* (1-t) * mask

        def _fold(a):
            # (rows, 128) -> (8, 128): tiling-preserving reshape + leading-axis
            # sum == pure VPU vreg adds (no per-chunk cross-lane XLU reduction).
            return a.reshape(rows // _SUBLANES, _SUBLANES, _LANES).sum(axis=0)

        out_ref[0, 0] += _fold(pos_raw)
        out_ref[0, 1] += _fold(pos_valid)
        out_ref[0, 2] += _fold(neg_raw)
        out_ref[0, 3] += _fold(neg_valid)

    chunk = min(_CHUNK_ROWS, tile_rows)
    nfull = tile_rows // chunk
    rem = tile_rows - nfull * chunk                       # static, multiple of 8

    def _accumulate_block():
        if nfull == 1 and rem == 0:
            _accum_chunk(0, tile_rows)
        else:
            @pl.loop(0, nfull)
            def _(i):
                _accum_chunk(pl.multiple_of(i * chunk, chunk), chunk)
            if rem:
                _accum_chunk(nfull * chunk, rem)

    if guard_overflow:
        # Odd block count split across 2 cores: the clamped duplicate block on
        # the last grid step of core 1 is skipped (DMA only, no accumulate).
        blk = pl.program_id(0) * blocks_per_core + j
        pl.when(blk < nblocks)(_accumulate_block)
    else:
        _accumulate_block()


def _partial_sums_kernel_call(i2d, t2d, v2d, max_th, min_th, tile_rows):
    """Run the Pallas kernel over (R, 128) views (R % tile_rows == 0);
    return the 4 un-normalized partial sums."""
    R = i2d.shape[0]
    nblocks = R // tile_rows

    # Always split row blocks across the 2 TensorCores (v7x) when there are at
    # least 2 blocks; on v5e/v6e the parallel axis runs sequentially (no cost).
    # TODO(synk): verify in xprof that dimension_semantics="parallel" shards the
    # leading axis across both v7x TCs; switch to pltpu.CORE_PARALLEL if not.
    if nblocks >= 2:
        p = 2
        bpc = pl.cdiv(nblocks, 2)
    else:
        p, bpc = 1, nblocks
    guard_overflow = (p * bpc != nblocks)

    has_valid = v2d is not None
    operands = [i2d, t2d] + ([v2d] if has_valid else [])

    if guard_overflow:
        def tile_index(c, j):
            return (jnp.minimum(c * bpc + j, nblocks - 1), 0)
    else:
        def tile_index(c, j):
            return (c * bpc + j, 0)
    tile_spec = pl.BlockSpec((tile_rows, _LANES), tile_index)

    kernel = functools.partial(
        _balanced_ce_kernel, max_th=float(max_th), min_th=float(min_th),
        tile_rows=tile_rows, nblocks=nblocks, blocks_per_core=bpc,
        has_valid=has_valid, guard_overflow=guard_overflow)

    n_elems = R * _LANES
    bytes_in = sum(int(op.size) * op.dtype.itemsize for op in operands)
    bytes_out = p * 4 * _SUBLANES * _LANES * 4
    cost = pl.CostEstimate(flops=22 * n_elems, transcendentals=2 * n_elems,
                           bytes_accessed=bytes_in + bytes_out)

    # Explicit VMEM budget: double-buffered input streams + headroom for the
    # chunked compute intermediates / output / compiler scratch.  Always within
    # every generation's physical VMEM (<= 48 MiB < 64 MiB on v7x).
    in_buf_bytes = sum(2 * tile_rows * _LANES * op.dtype.itemsize for op in operands)
    vmem_limit = int(min(in_buf_bytes + (16 << 20), 48 << 20))

    part = pl.pallas_call(
        kernel,
        out_shape=jax.ShapeDtypeStruct((p, 4, _SUBLANES, _LANES), jnp.float32),
        grid_spec=pltpu.PrefetchScalarGridSpec(
            num_scalar_prefetch=0,
            grid=(p, bpc),
            in_specs=[tile_spec] * len(operands),
            out_specs=pl.BlockSpec((1, 4, _SUBLANES, _LANES),
                                   lambda c, j: (c, 0, 0, 0)),
        ),
        compiler_params=pltpu.CompilerParams(
            dimension_semantics=("parallel", "arbitrary"),
            vmem_limit_bytes=vmem_limit),
        cost_estimate=cost,
    )(*operands)
    return part.sum(axis=(0, 2, 3))               # (4,) partial sums


def _tail_sums(x, t, v, max_th, min_th):
    """Plain-JAX partial sums (same sign convention as the kernel) for the
    ragged tail that does not fill a whole kernel block."""
    x = x.astype(jnp.float32)
    t = t.astype(jnp.float32)
    v = jnp.ones_like(x) if v is None else v.astype(jnp.float32)
    pos_valid = jnp.where(t > max_th, v, 0.0)
    neg_valid = jnp.where(t < min_th, v, 0.0)
    pos_raw = jax.nn.log_sigmoid(x) * t * pos_valid            # un-negated
    neg_raw = -jax.nn.log_sigmoid(-x) * (1.0 - t) * neg_valid  # = neg_term * mask
    return jnp.stack([jnp.sum(pos_raw), jnp.sum(pos_valid),
                      jnp.sum(neg_raw), jnp.sum(neg_valid)])


def balanced_cross_entropy_loss_with_logits(inp, target, valid=None,
                                            max_th=0.95, min_th=0.05,
                                            *, _tile_rows_cap=None):
    """Balanced BCE-with-logits, matching the PyTorch reference.

    Perf contract: pass `inp`/`target` in their native dtype (bf16 is fine) and
    keep `valid` narrow (bool/int8) — everything is cast to f32 in-VMEM inside
    the kernel; a wrapper-side cast would add a full extra HBM pass.
    """
    has_valid = valid is not None
    n = int(inp.size)
    flat_i = jnp.reshape(inp, (-1,))
    flat_t = jnp.reshape(target, (-1,))
    flat_v = jnp.reshape(valid, (-1,)) if has_valid else None

    num_streams = 3 if has_valid else 2
    rows_total = n // _LANES

    sums = jnp.zeros((4,), jnp.float32)
    n_main = 0
    if rows_total >= _SUBLANES:
        tile_rows = _select_tile_rows(rows_total, num_streams, _tile_rows_cap)
        nblocks = rows_total // tile_rows
        rows_kernel = nblocks * tile_rows
        n_main = rows_kernel * _LANES
        i2d = flat_i[:n_main].reshape(rows_kernel, _LANES)
        t2d = flat_t[:n_main].reshape(rows_kernel, _LANES)
        v2d = flat_v[:n_main].reshape(rows_kernel, _LANES) if has_valid else None
        sums = sums + _partial_sums_kernel_call(i2d, t2d, v2d, max_th, min_th,
                                                tile_rows)
    if n_main < n:
        sums = sums + _tail_sums(flat_i[n_main:], flat_t[n_main:],
                                 flat_v[n_main:] if has_valid else None,
                                 max_th, min_th)

    # Sign restoration: sums[0] holds  sum(logsigmoid(x)*t*mask)  (un-negated),
    # sums[2] already holds            sum(-logsigmoid(-x)*(1-t)*mask).
    pos_loss = -sums[0] / (sums[1] + _EPS)
    neg_loss = sums[2] / (sums[3] + _EPS)
    return pos_loss + neg_loss


class BalancedCrossEntropy:
    def __init__(self, max_th: float = 0.95, min_th: float = 0.05):
        self._max_th = max_th
        self._min_th = min_th

    def __call__(self, inp, target, valid=None):
        return balanced_cross_entropy_loss_with_logits(
            inp, target, valid, max_th=self._max_th, min_th=self._min_th)


def _reference(inp, target, valid, max_th=0.95, min_th=0.05):
    """Pure-JAX reference mirroring the PyTorch forward."""
    inp = inp.astype(jnp.float32)
    target = target.astype(jnp.float32)
    if valid is None:
        valid = jnp.ones_like(inp)
    valid = valid.astype(jnp.float32)
    pos_valid = (target > max_th).astype(jnp.float32) * valid
    neg_valid = (target < min_th).astype(jnp.float32) * valid
    log_probs_pos = jax.nn.log_sigmoid(inp)
    log_probs_neg = jax.nn.log_sigmoid(-inp)
    pos_term = -log_probs_pos * target
    neg_term = -log_probs_neg * (1.0 - target)
    pos_loss = jnp.sum(pos_term * pos_valid) / (jnp.sum(pos_valid) + _EPS)
    neg_loss = jnp.sum(neg_term * neg_valid) / (jnp.sum(neg_valid) + _EPS)
    return pos_loss + neg_loss


if __name__ == "__main__":
    key = jax.random.PRNGKey(0)
    k1, k2, k3, k4, k5, k6, k7, k8, k9 = jax.random.split(key, 9)

    # Small shapes matching the module's (B, C, *) contract.
    B, C, H, W = 2, 4, 16, 16
    x = jax.random.normal(k1, (B, C, H, W), dtype=jnp.float32) * 2.0
    t = jax.random.uniform(k2, (B, C, H, W), dtype=jnp.float32)
    valid = (jax.random.uniform(k3, (B, C, H, W)) > 0.2).astype(jnp.float32)

    loss_fn = BalancedCrossEntropy(max_th=0.95, min_th=0.05)

    loss = jax.block_until_ready(loss_fn(x, t, valid))
    ref = _reference(x, t, valid)
    assert jnp.allclose(loss, ref, rtol=1e-5, atol=1e-5), (loss, ref)

    # valid=None specialization (kernel streams only two arrays).
    loss_nv = jax.block_until_ready(loss_fn(x, t, None))
    ref_nv = _reference(x, t, None)
    assert jnp.allclose(loss_nv, ref_nv, rtol=1e-5, atol=1e-5), (loss_nv, ref_nv)

    # Non-aligned shape with a bool mask: exercises the JAX-side element tail
    # and the narrow (1-byte) valid stream through the kernel.
    B2, C2, H2, W2 = 1, 1, 520, 520            # 270400 elements
    x2 = jax.random.normal(k4, (B2, C2, H2, W2), dtype=jnp.float32)
    t2 = jax.random.uniform(k5, (B2, C2, H2, W2), dtype=jnp.float32)
    v2 = jax.random.uniform(k6, (B2, C2, H2, W2)) > 0.5
    loss2 = jax.block_until_ready(loss_fn(x2, t2, v2))
    ref2 = _reference(x2, t2, v2)
    assert jnp.allclose(loss2, ref2, rtol=1e-3, atol=1e-5), (loss2, ref2)

    # bf16 inputs + forced tiny tile (test-only cap) so nblocks=3: exercises the
    # 2-core split with an odd block count (clamped index_map + pl.when skip).
    B3, C3, H3, W3 = 2, 4, 16, 24              # 3072 elements -> 24 rows -> 3 blocks of 8
    x3 = (jax.random.normal(k7, (B3, C3, H3, W3)) * 2.0).astype(jnp.bfloat16)
    t3 = jax.random.uniform(k8, (B3, C3, H3, W3)).astype(jnp.bfloat16)
    v3 = jax.random.uniform(k9, (B3, C3, H3, W3)) > 0.3
    loss3 = jax.block_until_ready(
        balanced_cross_entropy_loss_with_logits(x3, t3, v3, _tile_rows_cap=8))
    ref3 = _reference(x3, t3, v3)
    assert jnp.allclose(loss3, ref3, rtol=1e-4, atol=1e-5), (loss3, ref3)

    print("KERNEL_OK")
</pallas_src>

<mosaic_0001>
module attributes {stable_mosaic.version = 11 : i64} {
  func.func @_balanced_ce_kernel(%arg0: i32, %arg1: i32, %arg2: memref<16x128xf32, #tpu.memory_space<vmem>>, %arg3: memref<16x128xf32, #tpu.memory_space<vmem>>, %arg4: memref<16x128xf32, #tpu.memory_space<vmem>>, %arg5: memref<1x4x8x128xf32, #tpu.memory_space<vmem>>) attributes {dimension_semantics = [#tpu.dimension_semantics<parallel>, #tpu.dimension_semantics<arbitrary>], iteration_bounds = array<i64: 1, 1>, scalar_prefetch = 0 : i64, scratch_operands = 0 : i64, tpu.core_type = #tpu.core_type<tc>, window_params = [{transform_indices = @transform_0, window_bounds = array<i64: 16, 128>}, {transform_indices = @transform_1, window_bounds = array<i64: 16, 128>}, {transform_indices = @transform_2, window_bounds = array<i64: 16, 128>}, {transform_indices = @transform_3, window_bounds = array<i64: 1, 4, 8, 128>}]} {
    %c0_i32 = arith.constant 0 : i32
    %0 = arith.cmpi eq, %arg1, %c0_i32 : i32
    %1 = arith.extui %0 : i1 to i32
    %c0_i32_0 = arith.constant 0 : i32
    %2 = arith.cmpi ne, %1, %c0_i32_0 : i32
    scf.if %2 {
      %cst_45 = arith.constant 0.000000e+00 : f32
      %62 = vector.broadcast %cst_45 : f32 to vector<1x4x8x128xf32>
      %c0_46 = arith.constant 0 : index
      %c0_47 = arith.constant 0 : index
      %c0_48 = arith.constant 0 : index
      %c0_49 = arith.constant 0 : index
      %63 = vector.load %arg5[%c0_46, %c0_47, %c0_48, %c0_49] : memref<1x4x8x128xf32, #tpu.memory_space<vmem>>, vector<1x4x8x128xf32>
      tpu.vector_store %arg5[%c0_46, %c0_47, %c0_48, %c0_49], %62 {strides = array<i32>} : memref<1x4x8x128xf32, #tpu.memory_space<vmem>>, vector<1x4x8x128xf32>,
    } else {
    }
    %c0 = arith.constant 0 : index
    %c0_1 = arith.constant 0 : index
    %3 = vector.load %arg2[%c0, %c0_1] : memref<16x128xf32, #tpu.memory_space<vmem>>, vector<16x128xf32>
    %c0_2 = arith.constant 0 : index
    %c0_3 = arith.constant 0 : index
    %4 = vector.load %arg3[%c0_2, %c0_3] : memref<16x128xf32, #tpu.memory_space<vmem>>, vector<16x128xf32>
    %c0_4 = arith.constant 0 : index
    %c0_5 = arith.constant 0 : index
    %5 = vector.load %arg4[%c0_4, %c0_5] : memref<16x128xf32, #tpu.memory_space<vmem>>, vector<16x128xf32>
    %cst = arith.constant 0.949999988 : f32
    %6 = vector.broadcast %cst : f32 to vector<16x128xf32>
    %7 = arith.cmpf ogt, %4, %6 : vector<16x128xf32>
    %cst_6 = arith.constant 0.000000e+00 : f32
    %8 = vector.broadcast %cst_6 : f32 to vector<16x128xf32>
    %9 = arith.select %7, %5, %8 : vector<16x128xi1>, vector<16x128xf32>
    %cst_7 = arith.constant 5.000000e-02 : f32
    %10 = vector.broadcast %cst_7 : f32 to vector<16x128xf32>
    %11 = arith.cmpf olt, %4, %10 : vector<16x128xf32>
    %cst_8 = arith.constant 0.000000e+00 : f32
    %12 = vector.broadcast %cst_8 : f32 to vector<16x128xf32>
    %13 = arith.select %11, %5, %12 : vector<16x128xi1>, vector<16x128xf32>
    %cst_9 = arith.constant 0.000000e+00 : f32
    %14 = vector.broadcast %cst_9 : f32 to vector<16x128xf32>
    %15 = arith.maximumf %3, %14 : vector<16x128xf32>
    %16 = math.absf %3 : vector<16x128xf32>
    %cst_10 = arith.constant 0.000000e+00 : f32
    %17 = vector.broadcast %cst_10 : f32 to vector<16x128xf32>
    %18 = arith.subf %17, %16 : vector<16x128xf32>
    %19 = math.exp %18 : vector<16x128xf32>
    %20 = math.log1p %19 : vector<16x128xf32>
    %21 = arith.subf %3, %15 : vector<16x128xf32>
    %22 = arith.subf %21, %20 : vector<16x128xf32>
    %23 = arith.mulf %22, %4 : vector<16x128xf32>
    %24 = arith.mulf %23, %9 : vector<16x128xf32>
    %25 = arith.addf %15, %20 : vector<16x128xf32>
    %cst_11 = arith.constant 1.000000e+00 : f32
    %26 = vector.broadcast %cst_11 : f32 to vector<16x128xf32>
    %27 = arith.subf %26, %4 : vector<16x128xf32>
    %28 = arith.mulf %25, %27 : vector<16x128xf32>
    %29 = arith.mulf %28, %13 : vector<16x128xf32>
    %c0_12 = arith.constant 0 : index
    %c0_13 = arith.constant 0 : index
    %c0_14 = arith.constant 0 : index
    %c0_15 = arith.constant 0 : index
    %30 = vector.load %arg5[%c0_12, %c0_13, %c0_14, %c0_15] : memref<1x4x8x128xf32, #tpu.memory_space<vmem>>, vector<1x1x8x128xf32>
    %31 = vector.shape_cast %30 : vector<1x1x8x128xf32> to vector<8x128xf32>
    %32 = vector.shape_cast %24 : vector<16x128xf32> to vector<2x8x128xf32>
    %cst_16 = arith.constant dense<0.000000e+00> : vector<8x128xf32>
    %33 = vector.multi_reduction <add>, %32, %cst_16 [0] : vector<2x8x128xf32> to vector<8x128xf32>
    %34 = arith.addf %31, %33 : vector<8x128xf32>
    %c0_17 = arith.constant 0 : index
    %c0_18 = arith.constant 0 : index
    %c0_19 = arith.constant 0 : index
    %c0_20 = arith.constant 0 : index
    %35 = vector.load %arg5[%c0_17, %c0_18, %c0_19, %c0_20] : memref<1x4x8x128xf32, #tpu.memory_space<vmem>>, vector<1x1x8x128xf32>
    %36 = vector.shape_cast %35 : vector<1x1x8x128xf32> to vector<8x128xf32>
    %37 = vector.shape_cast %34 : vector<8x128xf32> to vector<1x1x8x128xf32>
    tpu.vector_store %arg5[%c0_17, %c0_18, %c0_19, %c0_20], %37 {strides = array<i32>} : memref<1x4x8x128xf32, #tpu.memory_space<vmem>>, vector<1x1x8x128xf32>,
    %c0_21 = arith.constant 0 : index
    %c1 = arith.constant 1 : index
    %c0_22 = arith.constant 0 : index
    %c0_23 = arith.constant 0 : index
    %38 = vector.load %arg5[%c0_21, %c1, %c0_22, %c0_23] : memref<1x4x8x128xf32, #tpu.memory_space<vmem>>, vector<1x1x8x128xf32>
    %39 = vector.shape_cast %38 : vector<1x1x8x128xf32> to vector<8x128xf32>
    %40 = vector.shape_cast %9 : vector<16x128xf32> to vector<2x8x128xf32>
    %cst_24 = arith.constant dense<0.000000e+00> : vector<8x128xf32>
    %41 = vector.multi_reduction <add>, %40, %cst_24 [0] : vector<2x8x128xf32> to vector<8x128xf32>
    %42 = arith.addf %39, %41 : vector<8x128xf32>
    %c0_25 = arith.constant 0 : index
    %c1_26 = arith.constant 1 : index
    %c0_27 = arith.constant 0 : index
    %c0_28 = arith.constant 0 : index
    %43 = vector.load %arg5[%c0_25, %c1_26, %c0_27, %c0_28] : memref<1x4x8x128xf32, #tpu.memory_space<vmem>>, vector<1x1x8x128xf32>
    %44 = vector.shape_cast %43 : vector<1x1x8x128xf32> to vector<8x128xf32>
    %45 = vector.shape_cast %42 : vector<8x128xf32> to vector<1x1x8x128xf32>
    tpu.vector_store %arg5[%c0_25, %c1_26, %c0_27, %c0_28], %45 {strides = array<i32>} : memref<1x4x8x128xf32, #tpu.memory_space<vmem>>, vector<1x1x8x128xf32>,
    %c0_29 = arith.constant 0 : index
    %c2 = arith.constant 2 : index
    %c0_30 = arith.constant 0 : index
    %c0_31 = arith.constant 0 : index
    %46 = vector.load %arg5[%c0_29, %c2, %c0_30, %c0_31] : memref<1x4x8x128xf32, #tpu.memory_space<vmem>>, vector<1x1x8x128xf32>
    %47 = vector.shape_cast %46 : vector<1x1x8x128xf32> to vector<8x128xf32>
    %48 = vector.shape_cast %29 : vector<16x128xf32> to vector<2x8x128xf32>
    %cst_32 = arith.constant dense<0.000000e+00> : vector<8x128xf32>
    %49 = vector.multi_reduction <add>, %48, %cst_32 [0] : vector<2x8x128xf32> to vector<8x128xf32>
    %50 = arith.addf %47, %49 : vector<8x128xf32>
    %c0_33 = arith.constant 0 : index
    %c2_34 = arith.constant 2 : index
    %c0_35 = arith.constant 0 : index
    %c0_36 = arith.constant 0 : index
    %51 = vector.load %arg5[%c0_33, %c2_34, %c0_35, %c0_36] : memref<1x4x8x128xf32, #tpu.memory_space<vmem>>, vector<1x1x8x128xf32>
    %52 = vector.shape_cast %51 : vector<1x1x8x128xf32> to vector<8x128xf32>
    %53 = vector.shape_cast %50 : vector<8x128xf32> to vector<1x1x8x128xf32>
    tpu.vector_store %arg5[%c0_33, %c2_34, %c0_35, %c0_36], %53 {strides = array<i32>} : memref<1x4x8x128xf32, #tpu.memory_space<vmem>>, vector<1x1x8x128xf32>,
    %c0_37 = arith.constant 0 : index
    %c3 = arith.constant 3 : index
    %c0_38 = arith.constant 0 : index
    %c0_39 = arith.constant 0 : index
    %54 = vector.load %arg5[%c0_37, %c3, %c0_38, %c0_39] : memref<1x4x8x128xf32, #tpu.memory_space<vmem>>, vector<1x1x8x128xf32>
    %55 = vector.shape_cast %54 : vector<1x1x8x128xf32> to vector<8x128xf32>
    %56 = vector.shape_cast %13 : vector<16x128xf32> to vector<2x8x128xf32>
    %cst_40 = arith.constant dense<0.000000e+00> : vector<8x128xf32>
    %57 = vector.multi_reduction <add>, %56, %cst_40 [0] : vector<2x8x128xf32> to vector<8x128xf32>
    %58 = arith.addf %55, %57 : vector<8x128xf32>
    %c0_41 = arith.constant 0 : index
    %c3_42 = arith.constant 3 : index
    %c0_43 = arith.constant 0 : index
    %c0_44 = arith.constant 0 : index
    %59 = vector.load %arg5[%c0_41, %c3_42, %c0_43, %c0_44] : memref<1x4x8x128xf32, #tpu.memory_space<vmem>>, vector<1x1x8x128xf32>
    %60 = vector.shape_cast %59 : vector<1x1x8x128xf32> to vector<8x128xf32>
    %61 = vector.shape_cast %58 : vector<8x128xf32> to vector<1x1x8x128xf32>
    tpu.vector_store %arg5[%c0_41, %c3_42, %c0_43, %c0_44], %61 {strides = array<i32>} : memref<1x4x8x128xf32, #tpu.memory_space<vmem>>, vector<1x1x8x128xf32>,
    return
  }
  func.func @transform_0(%arg0: i32, %arg1: i32) -> (i32, i32) {
    %c1_i32 = arith.constant 1 : i32
    %0 = arith.muli %arg0, %c1_i32 : i32
    %1 = arith.addi %0, %arg1 : i32
    %c0_i32 = arith.constant 0 : i32
    %c0_i32_0 = arith.constant 0 : i32
    return %1, %c0_i32 : i32, i32
  }
  func.func @transform_1(%arg0: i32, %arg1: i32) -> (i32, i32) {
    %c1_i32 = arith.constant 1 : i32
    %0 = arith.muli %arg0, %c1_i32 : i32
    %1 = arith.addi %0, %arg1 : i32
    %c0_i32 = arith.constant 0 : i32
    %c0_i32_0 = arith.constant 0 : i32
    return %1, %c0_i32 : i32, i32
  }
  func.func @transform_2(%arg0: i32, %arg1: i32) -> (i32, i32) {
    %c1_i32 = arith.constant 1 : i32
    %0 = arith.muli %arg0, %c1_i32 : i32
    %1 = arith.addi %0, %arg1 : i32
    %c0_i32 = arith.constant 0 : i32
    %c0_i32_0 = arith.constant 0 : i32
    return %1, %c0_i32 : i32, i32
  }
  func.func @transform_3(%arg0: i32, %arg1: i32) -> (i32, i32, i32, i32) {
    %c0_i32 = arith.constant 0 : i32
    %c0_i32_0 = arith.constant 0 : i32
    %c0_i32_1 = arith.constant 0 : i32
    %c0_i32_2 = arith.constant 0 : i32
    return %arg0, %c0_i32, %c0_i32_0, %c0_i32_1 : i32, i32, i32, i32
  }
}

</mosaic_0001>

<bundles_post_ra>
// kernel: tpu_custom_call.1
= control target key start
LH: loop header
LB: loop body
LE: loop exit
PB: predicated region body
PF: predicated region fallthrough
CT: control target
= control target key end

     0   :  { %8 = vsyncpa [#allocation3], 0  ;;  %s379_s0 = inlined_call_operand.hbm [shape: f32[16,128], index: 0, kind: input, shape index: {}]   ;;  %s380_s1 = inlined_call_operand.hbm [shape: f32[16,128], index: 1, kind: input, shape index: {}]   ;;  %s381_s2 = inlined_call_operand.hbm [shape: f32[16,128], index: 2, kind: input, shape index: {}]   ;;  %s382_s3 = inlined_call_operand.hbm [shape: f32[1,4,8,128], index: 3, kind: output, shape index: {}]  }
   0x1   :  { %9 = vsyncpa [#allocation6], 0 }
   0x2   :  { %10 = vsyncpa [#allocation4], 0  ;;  %s286_s12 = smov [#allocation5]   ;;  %s287_s14 = smov [#allocation2]  }
   0x3   :  { %s36_s13 = sshll.u32 %s286_s12, 4  ;;  %s20_s15 = sshll.u32 %s287_s14, 4  ;;  %s37_s13 = int_to_ptr.vmem [resolvable:$true] %s36_s13  ;;  %s312_s15 = int_to_ptr.vmem [resolvable:$true] %s20_s15 }
   0x4   :  { %s192_s18 = scalar_lea.hbm %s380_s1, 256 }
   0x5   :  { %p193_p0 = scmp.ne.s32.totalorder %s380_s1, %s192_s18  ;;  %p196_p1 = scmp.lt.u32.totalorder %s192_s18, %s380_s1 }
   0x7   :  { %p198_p2 = pnand %p196_p1, %p193_p0 }
   0x9   :  { %201 = shalt.err (!%p198_p2)
}
   0xa   :  { %s202_s23 = scalar_lea.vmem %s37_s13, 256  ;;  %p207_p4 = scmp.lt.s32.totalorder %s37_s13, %s37_s13 }
   0xb   :  { %p203_p3 = scmp.ne.s32.totalorder %s37_s13, %s202_s23  ;;  %p208_p5 = scmp.lt.s32.totalorder %s202_s23, %s202_s23 }
   0xd   :  { %p209_p6 = por %p208_p5, %p207_p4 }
   0xf   :  { %p210_p7 = pnand %p209_p6, %p203_p3 }
  0x11   :  { %213 = shalt.err (!%p210_p7)
}
  0x12   :  { %s288_s24 = smov 128   ;;  %s289_s25 = smov 8  }
  0x13   :  { %42 = dma.hbm_to_vmem [thread:$0]  %s380_s1, 256, %s37_s13, [#allocation6], %s288_s24, %s288_s24, %s289_s25  }
  0x14   :  { %s214_s30 = scalar_lea.hbm %s379_s0, 256 }
  0x15   :  { %p215_p8 = scmp.ne.s32.totalorder %s379_s0, %s214_s30  ;;  %p218_p9 = scmp.lt.u32.totalorder %s214_s30, %s379_s0 }
  0x17   :  { %p220_p10 = pnand %p218_p9, %p215_p8 }
  0x19   :  { %223 = shalt.err (!%p220_p10)
}
  0x1a   :  { %s224_s8 = scalar_lea.vmem %s312_s15, 256  ;;  %p229_p12 = scmp.lt.s32.totalorder %s312_s15, %s312_s15 }
  0x1b   :  { %p225_p11 = scmp.ne.s32.totalorder %s312_s15, %s224_s8  ;;  %p230_p13 = scmp.lt.s32.totalorder %s224_s8, %s224_s8 }
  0x1d   :  { %p231_p0 = por %p230_p13, %p229_p12 }
  0x1f   :  { %p232_p1 = pnand %p231_p0, %p225_p11 }
  0x21   :  { %235 = shalt.err (!%p232_p1)
}
  0x22   :  { %26 = dma.hbm_to_vmem [thread:$0]  %s379_s0, 256, %s312_s15, [#allocation3], %s288_s24, %s288_s24, %s289_s25  }
  0x23   :  { %s290_s10 = smov [#allocation7]   ;;  %s236_s14 = scalar_lea.hbm %s381_s2, 256 }
  0x24   :  { %s52_s11 = sshll.u32 %s290_s10, 4  ;;  %p237_p2 = scmp.ne.s32.totalorder %s381_s2, %s236_s14  ;;  %s53_s11 = int_to_ptr.vmem [resolvable:$true] %s52_s11 }
  0x25   :  { %p240_p3 = scmp.lt.u32.totalorder %s236_s14, %s381_s2 }
  0x27   :  { %p242_p4 = pnand %p240_p3, %p237_p2 }
  0x29   :  { %245 = shalt.err (!%p242_p4)
}
  0x2a   :  { %s246_s20 = scalar_lea.vmem %s53_s11, 256  ;;  %p251_p6 = scmp.lt.s32.totalorder %s53_s11, %s53_s11 }
  0x2b   :  { %p247_p5 = scmp.ne.s32.totalorder %s53_s11, %s246_s20  ;;  %p252_p7 = scmp.lt.s32.totalorder %s246_s20, %s246_s20 }
  0x2d   :  { %p253_p8 = por %p252_p7, %p251_p6 }
  0x2f   :  { %p254_p9 = pnand %p253_p8, %p247_p5 }
  0x31   :  { %257 = shalt.err (!%p254_p9)
}
  0x32   :  { %58 = dma.hbm_to_vmem [thread:$0]  %s381_s2, 256, %s53_s11, [#allocation6], %s288_s24, %s288_s24, %s289_s25  }
  0x33   :  { %280 = dma.done.wait [#allocation3], 256  }
  0x34   :  { %281 = vsyncadd [#allocation3], 4294967040 }
  0x35   :  { %282 = dma.done.wait [#allocation6], 512  }
  0x36   :  { %283 = vsyncadd [#allocation6], 4294966784  ;;  %v82_v0 = vld [vmem:[#allocation2] sm:$0xff]  ;;  %v83_v1 = vld [vmem:[#allocation2 + $0x8] sm:$0xff]  ;;  %s291_s2 = smov [#allocation8]  }
  0x37   :  { %v84_v2 = vld [vmem:[#allocation5] sm:$0xff]  ;;  %v85_v3 = vld [vmem:[#allocation5 + $0x8] sm:$0xff]  ;;  %v86_v4 = vld [vmem:[#allocation7] sm:$0xff]  ;;  %v98_v6 = vand.u32 2147483647, %v82_v0  ;;  %v96_v25 = vmax.f32 %v82_v0, 0.0 }
  0x38   :  { %v87_v5 = vld [vmem:[#allocation7 + $0x8] sm:$0xff]  ;;  %vm88_vm0 = vcmp.gt.f32.partialorder %v84_v2, 0.95  ;;  %vm89_vm1 = vcmp.gt.f32.partialorder %v85_v3, 0.95  ;;  %v97_v28 = vmax.f32 %v83_v1, 0.0 }
  0x39   :  { %v90_v7 = vsel %vm88_vm0, %v86_v4, 0.0  ;;  %v91_v8 = vsel %vm89_vm1, %v87_v5, 0.0  ;;  %v99_v9 = vand.u32 2147483647, %v83_v1  ;;  %vm92_vm2 = vcmp.lt.f32.partialorder %v84_v2, 0.05 }
  0x3a   :  { %v100_v10 = vsub.f32 0.0, %v98_v6  ;;  %v146_v11 = vadd.f32 %v91_v8, %v90_v7  ;;  %vm93_vm3 = vcmp.lt.f32.partialorder %v85_v3, 0.05  ;;  %v94_v13 = vsel %vm92_vm2, %v86_v4, 0.0  ;;  %s164_s21 = sshll.u32 %s291_s2, 4  ;;  %s165_s21 = int_to_ptr.vmem [resolvable:$true] %s164_s21 }
  0x3b   :  { %v101_v12 = vsub.f32 0.0, %v99_v9  ;;  %v95_v14 = vsel %vm93_vm3, %v87_v5, 0.0  ;;  %v124_v33 = vsub.f32 %v82_v0, %v96_v25  ;;  %v125_v36 = vsub.f32 %v83_v1, %v97_v28  ;;  %s258_s22 = scalar_lea.vmem %s165_s21, 512  ;;  %p263_p11 = scmp.lt.s32.totalorder %s165_s21, %s165_s21 }
  0x3c   :  { %v102_v15 = vmul.f32 1.442695, %v100_v10  ;;  %v156_v16 = vadd.f32 %v95_v14, %v94_v13  ;;  %148 = vst [vmem:[#allocation8 + $0x8] sm:$0xff] %v146_v11  ;;  %v134_v38 = vsub.f32 1.0, %v84_v2  ;;  %v135_v40 = vsub.f32 1.0, %v85_v3  ;;  %p259_p10 = scmp.ne.s32.totalorder %s165_s21, %s258_s22  ;;  %p264_p12 = scmp.lt.s32.totalorder %s258_s22, %s258_s22 }
  0x3d   :  { %v104_v17 = vmul.f32 1.442695, %v101_v12 }
  0x3e   :  { %184 = vpow2.f32 %v102_v15  ;;  %158 = vst [vmem:[#allocation8 + $0x18] sm:$0xff] %v156_v16  ;;  %p265_p13 = por %p264_p12, %p263_p11 }
  0x3f   :  { %186 = vpow2.f32 %v104_v17 }
  0x40   :  { %p266_p0 = pnand %p265_p13, %p259_p10 }
  0x48   :  { %v185_v18 = vpop.eup %184 }
  0x49   :  { %v187_v19 = vpop.eup %186  ;;  %v106_v20 = vadd.f32 1.0, %v185_v18  ;;  %v109_v22 = vmul.f32 -0.5, %v185_v18  ;;  %v112_v26 = vand.u32 2147483647, %v185_v18 }
  0x4a   :  { %v115_v21 = vadd.f32 1.0, %v187_v19  ;;  %v118_v23 = vmul.f32 -0.5, %v187_v19  ;;  %v121_v29 = vand.u32 2147483647, %v187_v19 }
  0x4b   :  { %188 = vlog2.f32 %v106_v20  ;;  %v110_v24 = vadd.f32 1.0, %v109_v22  ;;  %vm113_vm4 = vcmp.lt.f32.partialorder %v112_v26, 0.0004427343 }
  0x4c   :  { %190 = vlog2.f32 %v115_v21  ;;  %v119_v27 = vadd.f32 1.0, %v118_v23  ;;  %vm122_vm5 = vcmp.lt.f32.partialorder %v121_v29, 0.0004427343 }
  0x4d   :  { %v111_v30 = vmul.f32 %v185_v18, %v110_v24 }
  0x4e   :  { %v120_v32 = vmul.f32 %v187_v19, %v119_v27 }
  0x55   :  { %v189_v31 = vpop.eup %188 }
  0x56   :  { %v191_v34 = vpop.eup %190  ;;  %v108_v35 = vmul.f32 0.6931472, %v189_v31 }
  0x57   :  { %v117_v37 = vmul.f32 0.6931472, %v191_v34 }
  0x58   :  { %v114_v39 = vsel %vm113_vm4, %v111_v30, %v108_v35 }
  0x59   :  { %v123_v41 = vsel %vm122_vm5, %v120_v32, %v117_v37  ;;  %v126_v42 = vsub.f32 %v124_v33, %v114_v39  ;;  %v132_v43 = vadd.f32 %v114_v39, %v96_v25 }
  0x5a   :  { %v127_v44 = vsub.f32 %v125_v36, %v123_v41  ;;  %v133_v45 = vadd.f32 %v123_v41, %v97_v28 }
  0x5b   :  { %v128_v46 = vmul.f32 %v126_v42, %v84_v2  ;;  %v136_v47 = vmul.f32 %v134_v38, %v132_v43 }
  0x5c   :  { %v129_v48 = vmul.f32 %v127_v44, %v85_v3  ;;  %v137_v49 = vmul.f32 %v135_v40, %v133_v45 }
  0x5d   :  { %v130_v50 = vmul.f32 %v128_v46, %v90_v7  ;;  %v138_v51 = vmul.f32 %v136_v47, %v94_v13 }
  0x5e   :  { %v131_v52 = vmul.f32 %v129_v48, %v91_v8  ;;  %v139_v53 = vmul.f32 %v137_v49, %v95_v14 }
  0x60   :  { %v141_v54 = vadd.f32 %v131_v52, %v130_v50  ;;  %v151_v55 = vadd.f32 %v139_v53, %v138_v51 }
  0x62   :  { %143 = vst [vmem:[#allocation8] sm:$0xff] %v141_v54  ;;  %153 = vst [vmem:[#allocation8 + $0x10] sm:$0xff] %v151_v55 }
  0x63   :  { %269 = shalt.err (!%p266_p0)
}
  0x64   :  { %s270_s27 = scalar_lea.hbm %s382_s3, 512 }
  0x65   :  { %p271_p1 = scmp.ne.s32.totalorder %s382_s3, %s270_s27  ;;  %p274_p2 = scmp.lt.u32.totalorder %s270_s27, %s382_s3 }
  0x67   :  { %p276_p3 = pnand %p274_p2, %p271_p1 }
  0x69   :  { %279 = shalt.err (!%p276_p3)
}
  0x6a   :  { %170 = dma.vmem_to_hbm [thread:$0]  %s165_s21, 512, %s382_s3, [#allocation4], %s288_s24, %s288_s24, %s289_s25  }
  0x6b   :  { %284 = dma.done.wait [#allocation4], 512  }
  0x6c   :  { %285 = vsyncadd [#allocation4], 4294966784 }
  0x6d   :  { %174 = vsyncpa [#allocation3], 1 }
  0x6e   :  { %175 = vsyncpa [#allocation6], 1 }
  0x6f   :  { %176 = vsyncpa [#allocation4], 1 }

</bundles_post_ra>
